<compile_context>
chip_gen: v6e
topology: v6e:2x2x1
jax: 0.10.0
libtpu: 0.0.40
codegen_flags: <defaults>
</compile_context>

<pallas_src>
import jax
import jax.numpy as jnp
from jax import lax
from jax.experimental import pallas as pl
from jax.experimental.pallas import tpu as pltpu


def _largest_divisor(n, limit, row_mult=1):
    """Largest d | n with d <= limit and (d * row_mult) % 8 == 0; fallback n.

    The fallback (d == n) keeps the block equal to the full dim, which always
    satisfies the (8, 128) block-shape rule.
    """
    best = None
    for d in range(1, n + 1):
        if n % d == 0 and d <= limit and (d * row_mult) % 8 == 0:
            best = d
    return n if best is None else best


# ----------------------------------------------------------------------------
# Conv2d (bias-free) Pallas kernel.
# Output is flat: (N, Ho*Wo, Cout).  Each grid step computes TH output rows as
# K*K accumulated bf16 matmuls of (TH*Wo, Cin) x (Cin, Cout) -> f32.
# ----------------------------------------------------------------------------
def conv2d_pallas(x_nhwc, w_hwio, *, stride, pad, target_rows=1024):
    N, H, W, Cin = x_nhwc.shape
    K, K2, Cin_w, Cout = w_hwio.shape
    assert K == K2 and Cin_w == Cin
    s = stride
    Ho = (H + 2 * pad - K) // s + 1
    Wo = (W + 2 * pad - K) // s + 1
    P = Ho * Wo

    # Pad spatially, then space-to-depth by the stride so each (kh, kw) tap is
    # a contiguous (TH, Wo, Cin) slice of one parity plane (no strided loads,
    # no HBM im2col).  For stride == 1 this is just the padded input.
    Hp, Wp = H + 2 * pad, W + 2 * pad
    Hq, Wq = -(-Hp // s), -(-Wp // s)
    xp = jnp.pad(
        x_nhwc,
        ((0, 0), (pad, pad + Hq * s - Hp), (pad, pad + Wq * s - Wp), (0, 0)),
    )
    xq = (
        xp.reshape(N, Hq, s, Wq, s, Cin)
        .transpose(0, 2, 4, 1, 3, 5)
        .reshape(N, s * s, Hq, Wq, Cin)
    )
    # Weights flattened per-tap, bf16 for the MXU (accumulation stays f32).
    w_flat = w_hwio.reshape(K * K, Cin, Cout).astype(jnp.bfloat16)

    # Output row-tiling: TH output rows (= TH*Wo matmul rows) per grid step.
    TH = _largest_divisor(Ho, max(1, target_rows // max(Wo, 1)), Wo)
    n_h = Ho // TH

    def kernel(xq_ref, w_ref, o_ref):
        oh0 = pl.program_id(1) * TH
        acc = jnp.zeros((TH * Wo, Cout), jnp.float32)
        for kh in range(K):                      # static unrolled taps
            for kw in range(K):
                plane = (kh % s) * s + (kw % s)
                lhs = xq_ref[0, plane,
                             pl.ds(oh0 + kh // s, TH),
                             pl.ds(kw // s, Wo), :]
                lhs = lhs.reshape(TH * Wo, Cin).astype(jnp.bfloat16)
                acc = acc + jnp.dot(lhs, w_ref[kh * K + kw],
                                    preferred_element_type=jnp.float32)
        o_ref[0] = acc.astype(o_ref.dtype)

    out_flat = pl.pallas_call(
        kernel,
        out_shape=jax.ShapeDtypeStruct((N, P, Cout), x_nhwc.dtype),
        grid=(N, n_h),
        in_specs=[
            # Whole padded image per batch element; block index depends only
            # on n, so it stays resident in VMEM across the row tiles.
            pl.BlockSpec((1, s * s, Hq, Wq, Cin), lambda n, h: (n, 0, 0, 0, 0)),
            pl.BlockSpec((K * K, Cin, Cout), lambda n, h: (0, 0, 0)),
        ],
        out_specs=pl.BlockSpec((1, TH * Wo, Cout), lambda n, h: (n, h, 0)),
        compiler_params=pltpu.CompilerParams(
            dimension_semantics=("parallel", "parallel")),
    )(xq, w_flat)
    return out_flat, (Ho, Wo)


# ----------------------------------------------------------------------------
# Fused elementwise kernel on flat (N, P, C) activations:
#   y = x*scale + shift [+ residual*res_scale + res_shift] [relu]
# (covers bn1+relu, and bn2 + shortcut-BN + residual-add + relu in one pass)
# ----------------------------------------------------------------------------
def bn_act_pallas(x_flat, scale, shift, *, relu,
                  residual=None, res_scale=None, res_shift=None,
                  target_rows=2048):
    N, P, C = x_flat.shape
    TP = _largest_divisor(P, target_rows, 1)
    n_p = P // TP

    s_main = scale.reshape(1, 1, C).astype(jnp.float32)
    b_main = shift.reshape(1, 1, C).astype(jnp.float32)

    row_spec = pl.BlockSpec((1, TP, C), lambda n, p: (n, p, 0))
    ch_spec = pl.BlockSpec((1, 1, C), lambda n, p: (0, 0, 0))
    cparams = pltpu.CompilerParams(
        dimension_semantics=("parallel", "parallel"))

    if residual is None:

        def kernel(x_ref, s_ref, b_ref, o_ref):
            y = x_ref[...] * s_ref[...] + b_ref[...]
            o_ref[...] = jnp.maximum(y, 0.0) if relu else y

        in_specs = [row_spec, ch_spec, ch_spec]
        args = (x_flat, s_main, b_main)
    else:
        s_res = res_scale.reshape(1, 1, C).astype(jnp.float32)
        b_res = res_shift.reshape(1, 1, C).astype(jnp.float32)

        def kernel(x_ref, r_ref, s_ref, b_ref, sr_ref, br_ref, o_ref):
            y = (x_ref[...] * s_ref[...] + b_ref[...]
                 + r_ref[...] * sr_ref[...] + br_ref[...])
            o_ref[...] = jnp.maximum(y, 0.0) if relu else y

        in_specs = [row_spec, row_spec, ch_spec, ch_spec, ch_spec, ch_spec]
        args = (x_flat, residual, s_main, b_main, s_res, b_res)

    return pl.pallas_call(
        kernel,
        out_shape=jax.ShapeDtypeStruct((N, P, C), x_flat.dtype),
        grid=(N, n_p),
        in_specs=in_specs,
        out_specs=row_spec,
        compiler_params=cparams,
    )(*args)


# ----------------------------------------------------------------------------
# BatchNorm (training mode: batch stats, biased variance) folded into a
# per-channel scale/shift.  Tiny per-channel reduction kept in glue.
# TODO(synk): could be folded into the conv epilogue as extra (sum, sumsq)
# outputs to save one activation-sized HBM read per BN.
# ----------------------------------------------------------------------------
def bn_scale_shift(x, gamma, beta, eps=1e-5):
    axes = tuple(range(x.ndim - 1))
    mean = jnp.mean(x, axis=axes)
    var = jnp.var(x, axis=axes)  # biased -> matches F.batch_norm(training=True)
    scale = gamma * lax.rsqrt(var + eps)
    shift = beta - mean * scale
    return scale, shift


# ----------------------------------------------------------------------------
# BasicBlock forward (NCHW in / NCHW out, matching the PyTorch module)
# ----------------------------------------------------------------------------
def basic_block_forward(x_nchw, params, *, stride):
    N, in_planes, H, W = x_nchw.shape
    planes = params["w1"].shape[-1]
    x = jnp.transpose(x_nchw, (0, 2, 3, 1))  # NCHW -> NHWC

    # conv1 -> bn1 -> relu           (flat (N, H1*W1, planes) activations)
    c1, (H1, W1) = conv2d_pallas(x, params["w1"], stride=stride, pad=1)
    s1, b1 = bn_scale_shift(c1, params["g1"], params["b1"])
    h = bn_act_pallas(c1, s1, b1, relu=True)

    # conv2 -> bn2
    c2, _ = conv2d_pallas(h.reshape(N, H1, W1, planes), params["w2"],
                          stride=1, pad=1)
    s2, b2 = bn_scale_shift(c2, params["g2"], params["b2"])

    # shortcut (its BN apply is fused into the final residual kernel)
    if stride != 1 or in_planes != planes:
        cs, _ = conv2d_pallas(x, params["ws"], stride=stride, pad=0)
        ss, bs = bn_scale_shift(cs, params["gs"], params["bs"])
    else:
        cs = x.reshape(N, H * W, in_planes)
        ss = jnp.ones((planes,), jnp.float32)
        bs = jnp.zeros((planes,), jnp.float32)

    # out = relu(bn2(conv2) + bn_shortcut(shortcut)) in one fused pass
    out = bn_act_pallas(c2, s2, b2, relu=True,
                        residual=cs, res_scale=ss, res_shift=bs)
    return out.reshape(N, H1, W1, planes).transpose(0, 3, 1, 2)  # -> NCHW


# ----------------------------------------------------------------------------
# Pure-JAX reference (bf16 conv operands, f32 accumulation -- same numerics
# as the kernels so a tight tolerance is meaningful).
# ----------------------------------------------------------------------------
def _ref_conv(x_nhwc, w_hwio, stride, pad):
    return lax.conv_general_dilated(
        x_nhwc.astype(jnp.bfloat16), w_hwio.astype(jnp.bfloat16),
        (stride, stride), [(pad, pad), (pad, pad)],
        dimension_numbers=("NHWC", "HWIO", "NHWC"),
        preferred_element_type=jnp.float32)


def basic_block_reference(x_nchw, params, *, stride):
    N, in_planes, H, W = x_nchw.shape
    planes = params["w1"].shape[-1]
    x = jnp.transpose(x_nchw, (0, 2, 3, 1))

    c1 = _ref_conv(x, params["w1"], stride, 1)
    s1, b1 = bn_scale_shift(c1, params["g1"], params["b1"])
    h = jnp.maximum(c1 * s1 + b1, 0.0)

    c2 = _ref_conv(h, params["w2"], 1, 1)
    s2, b2 = bn_scale_shift(c2, params["g2"], params["b2"])

    if stride != 1 or in_planes != planes:
        cs = _ref_conv(x, params["ws"], stride, 0)
        ss, bs = bn_scale_shift(cs, params["gs"], params["bs"])
        sc = cs * ss + bs
    else:
        sc = x

    out = jnp.maximum(c2 * s2 + b2 + sc, 0.0)
    return jnp.transpose(out, (0, 3, 1, 2))


# ----------------------------------------------------------------------------
def make_params(key, in_planes, planes):
    ks = jax.random.split(key, 9)
    f32 = jnp.float32

    def conv_init(k, kh, kw, cin, cout):
        fan_in = kh * kw * cin
        return (jax.random.normal(k, (kh, kw, cin, cout), f32)
                * jnp.sqrt(2.0 / fan_in))

    return {
        "w1": conv_init(ks[0], 3, 3, in_planes, planes),
        "g1": 1.0 + 0.1 * jax.random.normal(ks[1], (planes,), f32),
        "b1": 0.1 * jax.random.normal(ks[2], (planes,), f32),
        "w2": conv_init(ks[3], 3, 3, planes, planes),
        "g2": 1.0 + 0.1 * jax.random.normal(ks[4], (planes,), f32),
        "b2": 0.1 * jax.random.normal(ks[5], (planes,), f32),
        "ws": conv_init(ks[6], 1, 1, in_planes, planes),
        "gs": 1.0 + 0.1 * jax.random.normal(ks[7], (planes,), f32),
        "bs": 0.1 * jax.random.normal(ks[8], (planes,), f32),
    }


if __name__ == "__main__":
    key = jax.random.PRNGKey(0)
    kx, kp, kx2, kp2 = jax.random.split(key, 4)

    # Config 1: projection shortcut (stride=2, in_planes != planes).
    N, Cin, H, W = 2, 4, 16, 16
    planes, stride = 8, 2
    x = jax.random.normal(kx, (N, Cin, H, W), jnp.float32)   # NCHW like PyTorch
    params = make_params(kp, Cin, planes)

    out = basic_block_forward(x, params, stride=stride)
    out = jax.block_until_ready(out)
    ref = basic_block_reference(x, params, stride=stride)
    assert out.shape == (N, planes, H // stride, W // stride), out.shape
    assert jnp.allclose(out, ref, rtol=1e-2, atol=1e-2), (
        "mismatch vs reference (proj path), max abs diff = %f"
        % float(jnp.max(jnp.abs(out - ref))))

    # Config 2: identity shortcut (stride=1, in_planes == planes).
    x2 = jax.random.normal(kx2, (N, planes, H, W), jnp.float32)
    params2 = make_params(kp2, planes, planes)
    out2 = jax.block_until_ready(basic_block_forward(x2, params2, stride=1))
    ref2 = basic_block_reference(x2, params2, stride=1)
    assert out2.shape == (N, planes, H, W), out2.shape
    assert jnp.allclose(out2, ref2, rtol=1e-2, atol=1e-2), (
        "mismatch vs reference (identity path), max abs diff = %f"
        % float(jnp.max(jnp.abs(out2 - ref2))))

    print("KERNEL_OK")
</pallas_src>

<mosaic_0001>
module attributes {stable_mosaic.version = 11 : i64} {
  func.func @kernel(%arg0: i32, %arg1: i32, %arg2: memref<1x4x9x9x4xf32, #tpu.memory_space<vmem>>, %arg3: memref<9x4x8xbf16, #tpu.memory_space<vmem>>, %arg4: memref<1x64x8xf32, #tpu.memory_space<vmem>>) attributes {dimension_semantics = [#tpu.dimension_semantics<parallel>, #tpu.dimension_semantics<parallel>], iteration_bounds = array<i64: 2, 1>, scalar_prefetch = 0 : i64, scratch_operands = 0 : i64, tpu.core_type = #tpu.core_type<tc>, window_params = [{transform_indices = @transform_0, window_bounds = array<i64: 1, 4, 9, 9, 4>}, {pipeline_mode = #tpu.pipeline_mode<synchronous>, transform_indices = @transform_1, window_bounds = array<i64: 9, 4, 8>}, {transform_indices = @transform_2, window_bounds = array<i64: 1, 64, 8>}]} {
    %c8_i32 = arith.constant 8 : i32
    %0 = arith.muli %arg1, %c8_i32 : i32
    %cst = arith.constant 0.000000e+00 : f32
    %1 = vector.broadcast %cst : f32 to vector<64x8xf32>
    %c0_i32 = arith.constant 0 : i32
    %2 = arith.addi %0, %c0_i32 : i32
    %c0 = arith.constant 0 : index
    %c0_0 = arith.constant 0 : index
    %3 = arith.index_cast %2 : i32 to index
    %c0_1 = arith.constant 0 : index
    %c0_2 = arith.constant 0 : index
    %4 = vector.load %arg2[%c0, %c0_0, %3, %c0_1, %c0_2] : memref<1x4x9x9x4xf32, #tpu.memory_space<vmem>>, vector<1x1x8x8x4xf32>
    %5 = vector.shape_cast %4 : vector<1x1x8x8x4xf32> to vector<8x8x4xf32>
    %6 = vector.shape_cast %5 : vector<8x8x4xf32> to vector<64x4xf32>
    %7 = arith.truncf %6 : vector<64x4xf32> to vector<64x4xbf16>
    %c0_3 = arith.constant 0 : index
    %c0_4 = arith.constant 0 : index
    %c0_5 = arith.constant 0 : index
    %8 = vector.load %arg3[%c0_3, %c0_4, %c0_5] : memref<9x4x8xbf16, #tpu.memory_space<vmem>>, vector<1x4x8xbf16>
    %9 = vector.shape_cast %8 : vector<1x4x8xbf16> to vector<4x8xbf16>
    %cst_6 = arith.constant dense<0.000000e+00> : vector<64x8xf32>
    %10 = tpu.matmul %7, %9, %cst_6 {dimension_numbers = #tpu.dot_dimension_numbers<[1], [0], [0], [1], [0, 0, 1, 1], [], []>} : vector<64x4xbf16>, vector<4x8xbf16>, vector<64x8xf32> -> vector<64x8xf32>
    %11 = arith.addf %1, %10 : vector<64x8xf32>
    %c0_i32_7 = arith.constant 0 : i32
    %12 = arith.addi %0, %c0_i32_7 : i32
    %c0_8 = arith.constant 0 : index
    %c1 = arith.constant 1 : index
    %13 = arith.index_cast %12 : i32 to index
    %c0_9 = arith.constant 0 : index
    %c0_10 = arith.constant 0 : index
    %14 = vector.load %arg2[%c0_8, %c1, %13, %c0_9, %c0_10] : memref<1x4x9x9x4xf32, #tpu.memory_space<vmem>>, vector<1x1x8x8x4xf32>
    %15 = vector.shape_cast %14 : vector<1x1x8x8x4xf32> to vector<8x8x4xf32>
    %16 = vector.shape_cast %15 : vector<8x8x4xf32> to vector<64x4xf32>
    %17 = arith.truncf %16 : vector<64x4xf32> to vector<64x4xbf16>
    %c1_11 = arith.constant 1 : index
    %c0_12 = arith.constant 0 : index
    %c0_13 = arith.constant 0 : index
    %18 = vector.load %arg3[%c1_11, %c0_12, %c0_13] : memref<9x4x8xbf16, #tpu.memory_space<vmem>>, vector<1x4x8xbf16>
    %19 = vector.shape_cast %18 : vector<1x4x8xbf16> to vector<4x8xbf16>
    %cst_14 = arith.constant dense<0.000000e+00> : vector<64x8xf32>
    %20 = tpu.matmul %17, %19, %cst_14 {dimension_numbers = #tpu.dot_dimension_numbers<[1], [0], [0], [1], [0, 0, 1, 1], [], []>} : vector<64x4xbf16>, vector<4x8xbf16>, vector<64x8xf32> -> vector<64x8xf32>
    %21 = arith.addf %11, %20 : vector<64x8xf32>
    %c0_i32_15 = arith.constant 0 : i32
    %22 = arith.addi %0, %c0_i32_15 : i32
    %c0_16 = arith.constant 0 : index
    %c0_17 = arith.constant 0 : index
    %23 = arith.index_cast %22 : i32 to index
    %c1_18 = arith.constant 1 : index
    %c0_19 = arith.constant 0 : index
    %24 = vector.load %arg2[%c0_16, %c0_17, %23, %c1_18, %c0_19] : memref<1x4x9x9x4xf32, #tpu.memory_space<vmem>>, vector<1x1x8x8x4xf32>
    %25 = vector.shape_cast %24 : vector<1x1x8x8x4xf32> to vector<8x8x4xf32>
    %26 = vector.shape_cast %25 : vector<8x8x4xf32> to vector<64x4xf32>
    %27 = arith.truncf %26 : vector<64x4xf32> to vector<64x4xbf16>
    %c2 = arith.constant 2 : index
    %c0_20 = arith.constant 0 : index
    %c0_21 = arith.constant 0 : index
    %28 = vector.load %arg3[%c2, %c0_20, %c0_21] : memref<9x4x8xbf16, #tpu.memory_space<vmem>>, vector<1x4x8xbf16>
    %29 = vector.shape_cast %28 : vector<1x4x8xbf16> to vector<4x8xbf16>
    %cst_22 = arith.constant dense<0.000000e+00> : vector<64x8xf32>
    %30 = tpu.matmul %27, %29, %cst_22 {dimension_numbers = #tpu.dot_dimension_numbers<[1], [0], [0], [1], [0, 0, 1, 1], [], []>} : vector<64x4xbf16>, vector<4x8xbf16>, vector<64x8xf32> -> vector<64x8xf32>
    %31 = arith.addf %21, %30 : vector<64x8xf32>
    %c0_i32_23 = arith.constant 0 : i32
    %32 = arith.addi %0, %c0_i32_23 : i32
    %c0_24 = arith.constant 0 : index
    %c2_25 = arith.constant 2 : index
    %33 = arith.index_cast %32 : i32 to index
    %c0_26 = arith.constant 0 : index
    %c0_27 = arith.constant 0 : index
    %34 = vector.load %arg2[%c0_24, %c2_25, %33, %c0_26, %c0_27] : memref<1x4x9x9x4xf32, #tpu.memory_space<vmem>>, vector<1x1x8x8x4xf32>
    %35 = vector.shape_cast %34 : vector<1x1x8x8x4xf32> to vector<8x8x4xf32>
    %36 = vector.shape_cast %35 : vector<8x8x4xf32> to vector<64x4xf32>
    %37 = arith.truncf %36 : vector<64x4xf32> to vector<64x4xbf16>
    %c3 = arith.constant 3 : index
    %c0_28 = arith.constant 0 : index
    %c0_29 = arith.constant 0 : index
    %38 = vector.load %arg3[%c3, %c0_28, %c0_29] : memref<9x4x8xbf16, #tpu.memory_space<vmem>>, vector<1x4x8xbf16>
    %39 = vector.shape_cast %38 : vector<1x4x8xbf16> to vector<4x8xbf16>
    %cst_30 = arith.constant dense<0.000000e+00> : vector<64x8xf32>
    %40 = tpu.matmul %37, %39, %cst_30 {dimension_numbers = #tpu.dot_dimension_numbers<[1], [0], [0], [1], [0, 0, 1, 1], [], []>} : vector<64x4xbf16>, vector<4x8xbf16>, vector<64x8xf32> -> vector<64x8xf32>
    %41 = arith.addf %31, %40 : vector<64x8xf32>
    %c0_i32_31 = arith.constant 0 : i32
    %42 = arith.addi %0, %c0_i32_31 : i32
    %c0_32 = arith.constant 0 : index
    %c3_33 = arith.constant 3 : index
    %43 = arith.index_cast %42 : i32 to index
    %c0_34 = arith.constant 0 : index
    %c0_35 = arith.constant 0 : index
    %44 = vector.load %arg2[%c0_32, %c3_33, %43, %c0_34, %c0_35] : memref<1x4x9x9x4xf32, #tpu.memory_space<vmem>>, vector<1x1x8x8x4xf32>
    %45 = vector.shape_cast %44 : vector<1x1x8x8x4xf32> to vector<8x8x4xf32>
    %46 = vector.shape_cast %45 : vector<8x8x4xf32> to vector<64x4xf32>
    %47 = arith.truncf %46 : vector<64x4xf32> to vector<64x4xbf16>
    %c4 = arith.constant 4 : index
    %c0_36 = arith.constant 0 : index
    %c0_37 = arith.constant 0 : index
    %48 = vector.load %arg3[%c4, %c0_36, %c0_37] : memref<9x4x8xbf16, #tpu.memory_space<vmem>>, vector<1x4x8xbf16>
    %49 = vector.shape_cast %48 : vector<1x4x8xbf16> to vector<4x8xbf16>
    %cst_38 = arith.constant dense<0.000000e+00> : vector<64x8xf32>
    %50 = tpu.matmul %47, %49, %cst_38 {dimension_numbers = #tpu.dot_dimension_numbers<[1], [0], [0], [1], [0, 0, 1, 1], [], []>} : vector<64x4xbf16>, vector<4x8xbf16>, vector<64x8xf32> -> vector<64x8xf32>
    %51 = arith.addf %41, %50 : vector<64x8xf32>
    %c0_i32_39 = arith.constant 0 : i32
    %52 = arith.addi %0, %c0_i32_39 : i32
    %c0_40 = arith.constant 0 : index
    %c2_41 = arith.constant 2 : index
    %53 = arith.index_cast %52 : i32 to index
    %c1_42 = arith.constant 1 : index
    %c0_43 = arith.constant 0 : index
    %54 = vector.load %arg2[%c0_40, %c2_41, %53, %c1_42, %c0_43] : memref<1x4x9x9x4xf32, #tpu.memory_space<vmem>>, vector<1x1x8x8x4xf32>
    %55 = vector.shape_cast %54 : vector<1x1x8x8x4xf32> to vector<8x8x4xf32>
    %56 = vector.shape_cast %55 : vector<8x8x4xf32> to vector<64x4xf32>
    %57 = arith.truncf %56 : vector<64x4xf32> to vector<64x4xbf16>
    %c5 = arith.constant 5 : index
    %c0_44 = arith.constant 0 : index
    %c0_45 = arith.constant 0 : index
    %58 = vector.load %arg3[%c5, %c0_44, %c0_45] : memref<9x4x8xbf16, #tpu.memory_space<vmem>>, vector<1x4x8xbf16>
    %59 = vector.shape_cast %58 : vector<1x4x8xbf16> to vector<4x8xbf16>
    %cst_46 = arith.constant dense<0.000000e+00> : vector<64x8xf32>
    %60 = tpu.matmul %57, %59, %cst_46 {dimension_numbers = #tpu.dot_dimension_numbers<[1], [0], [0], [1], [0, 0, 1, 1], [], []>} : vector<64x4xbf16>, vector<4x8xbf16>, vector<64x8xf32> -> vector<64x8xf32>
    %61 = arith.addf %51, %60 : vector<64x8xf32>
    %c1_i32 = arith.constant 1 : i32
    %62 = arith.addi %0, %c1_i32 : i32
    %c0_47 = arith.constant 0 : index
    %c0_48 = arith.constant 0 : index
    %63 = arith.index_cast %62 : i32 to index
    %c0_49 = arith.constant 0 : index
    %c0_50 = arith.constant 0 : index
    %64 = vector.load %arg2[%c0_47, %c0_48, %63, %c0_49, %c0_50] : memref<1x4x9x9x4xf32, #tpu.memory_space<vmem>>, vector<1x1x8x8x4xf32>
    %65 = vector.shape_cast %64 : vector<1x1x8x8x4xf32> to vector<8x8x4xf32>
    %66 = vector.shape_cast %65 : vector<8x8x4xf32> to vector<64x4xf32>
    %67 = arith.truncf %66 : vector<64x4xf32> to vector<64x4xbf16>
    %c6 = arith.constant 6 : index
    %c0_51 = arith.constant 0 : index
    %c0_52 = arith.constant 0 : index
    %68 = vector.load %arg3[%c6, %c0_51, %c0_52] : memref<9x4x8xbf16, #tpu.memory_space<vmem>>, vector<1x4x8xbf16>
    %69 = vector.shape_cast %68 : vector<1x4x8xbf16> to vector<4x8xbf16>
    %cst_53 = arith.constant dense<0.000000e+00> : vector<64x8xf32>
    %70 = tpu.matmul %67, %69, %cst_53 {dimension_numbers = #tpu.dot_dimension_numbers<[1], [0], [0], [1], [0, 0, 1, 1], [], []>} : vector<64x4xbf16>, vector<4x8xbf16>, vector<64x8xf32> -> vector<64x8xf32>
    %71 = arith.addf %61, %70 : vector<64x8xf32>
    %c1_i32_54 = arith.constant 1 : i32
    %72 = arith.addi %0, %c1_i32_54 : i32
    %c0_55 = arith.constant 0 : index
    %c1_56 = arith.constant 1 : index
    %73 = arith.index_cast %72 : i32 to index
    %c0_57 = arith.constant 0 : index
    %c0_58 = arith.constant 0 : index
    %74 = vector.load %arg2[%c0_55, %c1_56, %73, %c0_57, %c0_58] : memref<1x4x9x9x4xf32, #tpu.memory_space<vmem>>, vector<1x1x8x8x4xf32>
    %75 = vector.shape_cast %74 : vector<1x1x8x8x4xf32> to vector<8x8x4xf32>
    %76 = vector.shape_cast %75 : vector<8x8x4xf32> to vector<64x4xf32>
    %77 = arith.truncf %76 : vector<64x4xf32> to vector<64x4xbf16>
    %c7 = arith.constant 7 : index
    %c0_59 = arith.constant 0 : index
    %c0_60 = arith.constant 0 : index
    %78 = vector.load %arg3[%c7, %c0_59, %c0_60] : memref<9x4x8xbf16, #tpu.memory_space<vmem>>, vector<1x4x8xbf16>
    %79 = vector.shape_cast %78 : vector<1x4x8xbf16> to vector<4x8xbf16>
    %cst_61 = arith.constant dense<0.000000e+00> : vector<64x8xf32>
    %80 = tpu.matmul %77, %79, %cst_61 {dimension_numbers = #tpu.dot_dimension_numbers<[1], [0], [0], [1], [0, 0, 1, 1], [], []>} : vector<64x4xbf16>, vector<4x8xbf16>, vector<64x8xf32> -> vector<64x8xf32>
    %81 = arith.addf %71, %80 : vector<64x8xf32>
    %c1_i32_62 = arith.constant 1 : i32
    %82 = arith.addi %0, %c1_i32_62 : i32
    %c0_63 = arith.constant 0 : index
    %c0_64 = arith.constant 0 : index
    %83 = arith.index_cast %82 : i32 to index
    %c1_65 = arith.constant 1 : index
    %c0_66 = arith.constant 0 : index
    %84 = vector.load %arg2[%c0_63, %c0_64, %83, %c1_65, %c0_66] : memref<1x4x9x9x4xf32, #tpu.memory_space<vmem>>, vector<1x1x8x8x4xf32>
    %85 = vector.shape_cast %84 : vector<1x1x8x8x4xf32> to vector<8x8x4xf32>
    %86 = vector.shape_cast %85 : vector<8x8x4xf32> to vector<64x4xf32>
    %87 = arith.truncf %86 : vector<64x4xf32> to vector<64x4xbf16>
    %c8 = arith.constant 8 : index
    %c0_67 = arith.constant 0 : index
    %c0_68 = arith.constant 0 : index
    %88 = vector.load %arg3[%c8, %c0_67, %c0_68] : memref<9x4x8xbf16, #tpu.memory_space<vmem>>, vector<1x4x8xbf16>
    %89 = vector.shape_cast %88 : vector<1x4x8xbf16> to vector<4x8xbf16>
    %cst_69 = arith.constant dense<0.000000e+00> : vector<64x8xf32>
    %90 = tpu.matmul %87, %89, %cst_69 {dimension_numbers = #tpu.dot_dimension_numbers<[1], [0], [0], [1], [0, 0, 1, 1], [], []>} : vector<64x4xbf16>, vector<4x8xbf16>, vector<64x8xf32> -> vector<64x8xf32>
    %91 = arith.addf %81, %90 : vector<64x8xf32>
    %c0_70 = arith.constant 0 : index
    %c0_71 = arith.constant 0 : index
    %c0_72 = arith.constant 0 : index
    %92 = vector.load %arg4[%c0_70, %c0_71, %c0_72] : memref<1x64x8xf32, #tpu.memory_space<vmem>>, vector<1x64x8xf32>
    %93 = vector.shape_cast %92 : vector<1x64x8xf32> to vector<64x8xf32>
    %94 = vector.shape_cast %91 : vector<64x8xf32> to vector<1x64x8xf32>
    tpu.vector_store %arg4[%c0_70, %c0_71, %c0_72], %94 {strides = array<i32>} : memref<1x64x8xf32, #tpu.memory_space<vmem>>, vector<1x64x8xf32>,
    return
  }
  func.func @transform_0(%arg0: i32, %arg1: i32) -> (i32, i32, i32, i32, i32) {
    %c0_i32 = arith.constant 0 : i32
    %c0_i32_0 = arith.constant 0 : i32
    %c0_i32_1 = arith.constant 0 : i32
    %c0_i32_2 = arith.constant 0 : i32
    %c0_i32_3 = arith.constant 0 : i32
    return %arg0, %c0_i32, %c0_i32_0, %c0_i32_1, %c0_i32_2 : i32, i32, i32, i32, i32
  }
  func.func @transform_1(%arg0: i32, %arg1: i32) -> (i32, i32, i32) {
    %c0_i32 = arith.constant 0 : i32
    %c0_i32_0 = arith.constant 0 : i32
    %c0_i32_1 = arith.constant 0 : i32
    %c0_i32_2 = arith.constant 0 : i32
    return %c0_i32, %c0_i32_0, %c0_i32_1 : i32, i32, i32
  }
  func.func @transform_2(%arg0: i32, %arg1: i32) -> (i32, i32, i32) {
    %c0_i32 = arith.constant 0 : i32
    %c0_i32_0 = arith.constant 0 : i32
    return %arg0, %arg1, %c0_i32 : i32, i32, i32
  }
}

</mosaic_0001>

<bundles_post_ra>
// kernel: tpu_custom_call.1
= control target key start
LH: loop header
LB: loop body
LE: loop exit
PB: predicated region body
PF: predicated region fallthrough
CT: control target
= control target key end

     0   :  { %s1516_s9 = smov 0   ;;  %s1518_s10 = smov 0   ;;  %s1808_s0 = inlined_call_operand.vmem [shape: f32[2,4,9,9,4], index: 0, kind: input, shape index: {}]   ;;  %s1809_s1 = inlined_call_operand.vmem [shape: bf16[9,4,8], index: 1, kind: input, shape index: {}]   ;;  %s1810_s2 = inlined_call_operand.vmem [shape: f32[2,64,8], index: 2, kind: output, shape index: {}]  }
   0x1   :  { %s1520_s11 = smov 0  }
   0x2 LB: > { %s24_s12 = sadd.s32 1, %s1495_s10  ;;  %p1198_p0 = scmp.ge.s32.totalorder %s1499_s11, 1  ;;  %s1499_s11 = sphi %s1520_s11, %s12_s11   ;;  %s1495_s10 = sphi %s1518_s10, %s1812_s10   ;;  %s1491_s9 = sphi %s1516_s9, %s1811_s9  }
   0x3   : > { %p26_p1 = scmp.ge.s32.totalorder %s24_s12, 2  ;;  %p126_p2 = scmp.lt.s32.totalorder %s1499_s11, 3 }
   0x5   : > { %s1814_s12 = smov (%p26_p1, %s24_s12), 0  ;;  %p127_p3 = pnand %p1198_p0, %p126_p2 }
   0x6   : > { %p152_p4 = scmp.lt.s32.totalorder (!%p127_p3), %s1491_s9, 1 }
   0x7   : > { %130 = sbr.rel (%p127_p3) target bundleno = 290 (0x122), region = 28 }
   0xc   : > { %v1210_v0 = vld [vmem:[%s1809_s1 + $0x2] sm:$0x3]  ;;  %vm213_vm0 = vcmask 1041408   ;;  %v183_v2 = vld [vmem:[%s1809_s1] sm:$0x3]  ;;  %s1816_s9 = smov (!%p152_p4, %s1491_s9), 1 }
   0xd   : > { %1443 = vmatprep.subr.msk.bf16.mxu1 %vm213_vm0, %v1210_v0  ;;  %1442 = vmatprep.subr.msk.bf16.mxu0 %vm213_vm0, %v1210_v0  ;;  %v215_v1 = vsel %vm213_vm0, %v1210_v0, 0  ;;  %v1219_v3 = vld [vmem:[%s1809_s1 + $0x4] sm:$0x3]  ;;  %s1452_s19 = smul.u32 576, %s1816_s9  ;;  %vm200_vm1 = vcmask 31744   ;;  %v295_v18 = vsel %vm213_vm0, %v183_v2, 0 }
   0xe   : > { %1441 = vmatpush3.bf16.msra.mxu1 %v215_v1  ;;  %1351 = vmatpush3.bf16.msra.mxu0 %v215_v1  ;;  %v389_v15 = vsel %vm213_vm0, %v1219_v3, 0  ;;  %v1232_v24 = vld [vmem:[%s1809_s1 + $0x6] sm:$0x3]  ;;  %v1245_v27 = vld [vmem:[%s1809_s1 + $0x8] sm:$0x3]  ;;  %s1304_s7 = sshll.u32 %s1816_s9, 6 }
   0xf   : > { %1444 = vmatprep.subr.msk.bf16.mxu1 %vm213_vm0, %v183_v2  ;;  %1445 = vmatprep.subr.msk.bf16.mxu0 %vm213_vm0, %v1219_v3  ;;  %s1554_s22 = scalar_lea.vmem %s1808_s0, %s1452_s19  ;;  %v597_v36 = vsel %vm213_vm0, %v1245_v27, 0  ;;  %v493_v38 = vsel %vm213_vm0, %v1232_v24, 0  ;;  %v1258_v40 = vld [vmem:[%s1809_s1 + $0xa] sm:$0x3]  ;;  %v1271_v41 = vld [vmem:[%s1809_s1 + $0xc] sm:$0x3]  ;;  %s1779_s14 = scalar_lea.vmem %s1810_s2, %s1304_s7 }
  0x10   : > { %v1202_v4 = vld [vmem:[%s1554_s22 + $0x90] sm:$0xff]  ;;  %v1558_v5 = vld [vmem:[%s1554_s22 + $0xa0] sm:$0xff]  ;;  %v804_v2 = vsel %vm213_vm0, %v1271_v41, 0  ;;  %vm1085_vm2 = vcmask 64512  }
  0x11   : > { %v1561_v6 = vld [vmem:[%s1554_s22 + $0xd0] sm:$0xff]  ;;  %v194_v7 = vpack.c.bf16 %v1558_v5, %v1202_v4  ;;  %v1565_v8 = vld [vmem:[%s1554_s22 + $0xe0] sm:$0xff]  ;;  %v699_v4 = vsel %vm213_vm0, %v1258_v40, 0 }
  0x12   : > { %v1568_v9 = vld [vmem:[%s1554_s22 + $0xb0] sm:$0xff]  ;;  %v1571_v10 = vld [vmem:[%s1554_s22 + $0xc0] sm:$0xff]  ;;  %v196_v11 = vpack.c.bf16 %v1565_v8, %v1561_v6 }
  0x13   : > { %v195_v12 = vpack.c.bf16 %v1571_v10, %v1568_v9  ;;  %v1578_v13 = vld [vmem:[%s1554_s22 + $0xf0] sm:$0xff]  ;;  %v1581_v14 = vld [vmem:[%s1554_s22 + $0x100] sm:$0xff]  ;;  %1352 = vmatprep.mubr.msk.bf16.mxu0 %vm200_vm1, %v194_v7 }
  0x14   : > { %v171_v16 = vld [vmem:[%s1554_s22] sm:$0xff]  ;;  %v197_v17 = vpack.c.bf16 %v1581_v14, %v1578_v13  ;;  %v1590_v19 = vld [vmem:[%s1554_s22 + $0x10] sm:$0xff]  ;;  %1356 = vmatprep.mubr.msk.bf16.mxu1 %vm200_vm1, %v196_v11  ;;  %v1284_v11 = vld [vmem:[%s1809_s1 + $0xe] sm:$0x3] }
  0x15   : > { %v362_v20 = vld [vmem:[%s1554_s22 + $0x1] sm:$0xff]  ;;  %v1594_v21 = vld [vmem:[%s1554_s22 + $0x11] sm:$0xff]  ;;  %1353 = vmatmul.mubr.msk.bf16.vlgmr.msra.gmra.mxu0 %vm200_vm1, %v195_v12  ;;  %v179_v22 = vpack.c.bf16 %v1590_v19, %v171_v16 }
  0x16   : > { %v370_v23 = vpack.c.bf16 %v1594_v21, %v362_v20  ;;  %1357 = vmatmul.mubr.msk.bf16.vlgmr.msra.gmra.mxu1 %vm200_vm1, %v197_v17  ;;  %1371 = vmatpush3.bf16.msra.mxu0 %v389_v15  ;;  %v1605_v25 = vld [vmem:[%s1554_s22 + $0x21] sm:$0xff]  ;;  %v1608_v26 = vld [vmem:[%s1554_s22 + $0x31] sm:$0xff] }
  0x17   : > { %1361 = vmatpush3.bf16.msra.mxu1 %v295_v18  ;;  %1362 = vmatprep.mubr.msk.bf16.mxu1 %vm200_vm1, %v179_v22  ;;  %v1615_v28 = vld [vmem:[%s1554_s22 + $0x20] sm:$0xff]  ;;  %v1618_v29 = vld [vmem:[%s1554_s22 + $0x30] sm:$0xff]  ;;  %v371_v32 = vpack.c.bf16 %v1608_v26, %v1605_v25 }
  0x18   : > { %1372 = vmatprep.mubr.msk.bf16.mxu0 %vm200_vm1, %v370_v23  ;;  %1446 = vmatprep.subr.msk.bf16.mxu1 %vm213_vm0, %v1232_v24  ;;  %v1623_v30 = vld [vmem:[%s1554_s22 + $0x40] sm:$0xff]  ;;  %v1626_v31 = vld [vmem:[%s1554_s22 + $0x50] sm:$0xff]  ;;  %v180_v35 = vpack.c.bf16 %v1618_v29, %v1615_v28 }
  0x19   : > { %1447 = vmatprep.subr.msk.bf16.mxu0 %vm213_vm0, %v1245_v27  ;;  %v1632_v33 = vld [vmem:[%s1554_s22 + $0x41] sm:$0xff]  ;;  %v1635_v34 = vld [vmem:[%s1554_s22 + $0x51] sm:$0xff]  ;;  %v181_v37 = vpack.c.bf16 %v1626_v31, %v1623_v30  ;;  %v785_v27 = vpack.c.bf16 %v1615_v28, %v1590_v19 }
  0x1a   : > { %v372_v39 = vpack.c.bf16 %v1635_v34, %v1632_v33  ;;  %v1654_v42 = vld [vmem:[%s1554_s22 + $0x60] sm:$0xff]  ;;  %v1660_v44 = vld [vmem:[%s1554_s22 + $0x71] sm:$0xff] }
  0x1b   : > { %v1657_v43 = vld [vmem:[%s1554_s22 + $0x61] sm:$0xff]  ;;  %v1664_v45 = vld [vmem:[%s1554_s22 + $0x70] sm:$0xff] }
  0x1c   : > { %v1237_v46 = vld [vmem:[%s1554_s22 + $0x1b0] sm:$0xff]  ;;  %v1238_v47 = vld [vmem:[%s1554_s22 + $0x1c0] sm:$0xff]  ;;  %v373_v50 = vpack.c.bf16 %v1660_v44, %v1657_v43  ;;  %v182_v52 = vpack.c.bf16 %v1664_v45, %v1654_v42 }
  0x1d   : > { %1373 = vmatmul.mubr.msk.bf16.vlgmr.msra.gmra.mxu0 %vm200_vm1, %v371_v32  ;;  %v1224_v48 = vld [vmem:[%s1554_s22 + $0x120] sm:$0xff]  ;;  %v1225_v49 = vld [vmem:[%s1554_s22 + $0x130] sm:$0xff]  ;;  %v578_v53 = vpack.c.bf16 %v1238_v47, %v1237_v46  ;;  %v787_v46 = vpack.c.bf16 %v1654_v42, %v1626_v31  ;;  %v991_v31 = vpack.c.bf16 %v1605_v25, %v1594_v21  ;;  %v889_v42 = vpack.c.bf16 %v1568_v9, %v1558_v5 }
  0x1e   : > { %1363 = vmatmul.mubr.msk.bf16.vlgmr.msra.gmra.mxu1 %vm200_vm1, %v180_v35  ;;  %1391 = vmatpush3.bf16.msra.mxu0 %v597_v36  ;;  %v1676_v51 = vld [vmem:[%s1554_s22 + $0x110] sm:$0xff]  ;;  %v474_v55 = vpack.c.bf16 %v1225_v49, %v1224_v48  ;;  %v1240_v57 = vld [vmem:[%s1554_s22 + $0x1e0] sm:$0xff]  ;;  %v993_v21 = vpack.c.bf16 %v1657_v43, %v1635_v34  ;;  %v891_v5 = vpack.c.bf16 %v1578_v13, %v1565_v8 }
  0x1f   : > { %1381 = vmatpush3.bf16.msra.mxu1 %v493_v38  ;;  %1366 = vmatprep.mubr.msk.bf16.mxu1 %vm200_vm1, %v181_v37  ;;  %v892_v54 = vpack.c.bf16 %v1676_v51, %v1581_v14  ;;  %v1239_v56 = vld [vmem:[%s1554_s22 + $0x1d0] sm:$0xff]  ;;  %v1226_v58 = vld [vmem:[%s1554_s22 + $0x140] sm:$0xff] }
  0x20   : > { %1376 = vmatprep.mubr.msk.bf16.mxu0 %vm200_vm1, %v372_v39  ;;  %1448 = vmatprep.subr.msk.bf16.mxu1 %vm213_vm0, %v1258_v40  ;;  %v1227_v59 = vld [vmem:[%s1554_s22 + $0x150] sm:$0xff]  ;;  %v1228_v60 = vld [vmem:[%s1554_s22 + $0x160] sm:$0xff]  ;;  %v579_v62 = vpack.c.bf16 %v1240_v57, %v1239_v56  ;;  %v786_v39 = vpack.c.bf16 %v1623_v30, %v1618_v29 }
  0x21   : > { %1449 = vmatprep.subr.msk.bf16.mxu0 %vm213_vm0, %v1271_v41  ;;  %v1229_v61 = vld [vmem:[%s1554_s22 + $0x170] sm:$0xff]  ;;  %v1242_v0 = vld [vmem:[%s1554_s22 + $0x200] sm:$0xff]  ;;  %v475_v1 = vpack.c.bf16 %v1227_v59, %v1226_v58  ;;  %v908_v41 = vsel %vm213_vm0, %v1284_v11, 0 }
  0x22   : > { %v1241_v63 = vld [vmem:[%s1554_s22 + $0x1f0] sm:$0xff]  ;;  %v476_v3 = vpack.c.bf16 %v1229_v61, %v1228_v60  ;;  %v1244_v15 = vld [vmem:[%s1554_s22 + $0x220] sm:$0xff] }
  0x23   : > { %v580_v7 = vpack.c.bf16 %v1242_v0, %v1241_v63  ;;  %v1243_v12 = vld [vmem:[%s1554_s22 + $0x210] sm:$0xff]  ;;  %v1230_v17 = vld [vmem:[%s1554_s22 + $0x180] sm:$0xff] }
  0x24   : > { %v1297_v16 = vld [vmem:[%s1809_s1 + $0x10] sm:$0x3]  ;;  %v1250_v20 = vld [vmem:[%s1554_s22 + $0x121] sm:$0xff]  ;;  %v581_v23 = vpack.c.bf16 %v1244_v15, %v1243_v12 }
  0x25   : > { %1377 = vmatmul.mubr.msk.bf16.gmra.mxu0 %vm200_vm1, %v373_v50  ;;  %v1231_v18 = vld [vmem:[%s1554_s22 + $0x190] sm:$0xff]  ;;  %v1252_v35 = vld [vmem:[%s1554_s22 + $0x141] sm:$0xff]  ;;  %v1010_v28 = vsel %vm213_vm0, %v1297_v16, 0  ;;  %v992_v50 = vpack.c.bf16 %v1632_v33, %v1608_v26 }
  0x26   : > { %1367 = vmatmul.mubr.msk.bf16.gmra.mxu1 %vm200_vm1, %v182_v52  ;;  %1392 = vmatprep.mubr.msk.bf16.mxu0 %vm200_vm1, %v578_v53  ;;  %v1251_v22 = vld [vmem:[%s1554_s22 + $0x131] sm:$0xff]  ;;  %v477_v24 = vpack.c.bf16 %v1231_v18, %v1230_v17  ;;  %v1254_v37 = vld [vmem:[%s1554_s22 + $0x161] sm:$0xff] }
  0x27   : > { %1382 = vmatprep.mubr.msk.bf16.mxu1 %vm200_vm1, %v474_v55  ;;  %v680_v32 = vpack.c.bf16 %v1251_v22, %v1250_v20  ;;  %v1253_v36 = vld [vmem:[%s1554_s22 + $0x151] sm:$0xff]  ;;  %v1270_v47 = vld [vmem:[%s1554_s22 + $0x80] sm:$0xff] }
  0x28   : > { %v1255_v38 = vld [vmem:[%s1554_s22 + $0x171] sm:$0xff]  ;;  %v681_v19 = vpack.c.bf16 %v1253_v36, %v1252_v35  ;;  %v1256_v48 = vld [vmem:[%s1554_s22 + $0x181] sm:$0xff]  ;;  %v788_v30 = vpack.c.bf16 %v1270_v47, %v1664_v45  ;;  %v890_v45 = vpack.c.bf16 %v1561_v6, %v1571_v10 }
  0x29   : > { %v682_v40 = vpack.c.bf16 %v1255_v38, %v1254_v37  ;;  %v1257_v29 = vld [vmem:[%s1554_s22 + $0x191] sm:$0xff]  ;;  %v1296_v9 = vld [vmem:[%s1554_s22 + $0x81] sm:$0xff] }
  0x2a   : > { %v683_v49 = vpack.c.bf16 %v1257_v29, %v1256_v48  ;;  %v994_v25 = vpack.c.bf16 %v1296_v9, %v1660_v44 }
  0x2d   : > { %1393 = vmatmul.mubr.msk.bf16.vlgmr.msra.gmra.mxu0 %vm200_vm1, %v579_v62 }
  0x2e   : > { %1383 = vmatmul.mubr.msk.bf16.vlgmr.msra.gmra.mxu1 %vm200_vm1, %v475_v1  ;;  %1411 = vmatpush3.bf16.msra.mxu0 %v804_v2 }
  0x2f   : > { %1401 = vmatpush3.bf16.msra.mxu1 %v699_v4  ;;  %1386 = vmatprep.mubr.msk.bf16.mxu1 %vm200_vm1, %v476_v3 }
  0x30   : > { %1396 = vmatprep.mubr.msk.bf16.mxu0 %vm200_vm1, %v580_v7  ;;  %1450 = vmatprep.subr.msk.bf16.mxu1 %vm213_vm0, %v1284_v11 }
  0x31   : > { %1451 = vmatprep.subr.msk.bf16.mxu0 %vm213_vm0, %v1297_v16 }
  0x35   : > { %1397 = vmatmul.mubr.msk.bf16.gmra.mxu0 %vm200_vm1, %v581_v23 }
  0x36   : > { %1387 = vmatmul.mubr.msk.bf16.gmra.mxu1 %vm200_vm1, %v477_v24  ;;  %1412 = vmatprep.mubr.msk.bf16.mxu0 %vm200_vm1, %v785_v27 }
  0x37   : > { %1402 = vmatprep.mubr.msk.bf16.mxu1 %vm200_vm1, %v680_v32 }
  0x3d   : > { %1413 = vmatmul.mubr.msk.bf16.vlgmr.msra.gmra.mxu0 %vm200_vm1, %v786_v39 }
  0x3e   : > { %1403 = vmatmul.mubr.msk.bf16.vlgmr.msra.gmra.mxu1 %vm200_vm1, %v681_v19  ;;  %1431 = vmatpush3.bf16.msra.mxu0 %v1010_v28 }
  0x3f   : > { %1421 = vmatpush3.bf16.msra.mxu1 %v908_v41  ;;  %1406 = vmatprep.mubr.msk.bf16.mxu1 %vm200_vm1, %v682_v40 }
  0x40   : > { %1416 = vmatprep.mubr.msk.bf16.mxu0 %vm200_vm1, %v787_v46 }
  0x45   : > { %1417 = vmatmul.mubr.msk.bf16.gmra.mxu0 %vm200_vm1, %v788_v30 }
  0x46   : > { %1407 = vmatmul.mubr.msk.bf16.gmra.mxu1 %vm200_vm1, %v683_v49  ;;  %1432 = vmatprep.mubr.msk.bf16.mxu0 %vm200_vm1, %v991_v31 }
  0x47   : > { %1422 = vmatprep.mubr.msk.bf16.mxu1 %vm200_vm1, %v889_v42 }
  0x4d   : > { %1433 = vmatmul.mubr.msk.bf16.vlgmr.msra.gmra.mxu0 %vm200_vm1, %v992_v50 }
  0x4e   : > { %1423 = vmatmul.mubr.msk.bf16.vlgmr.msra.gmra.mxu1 %vm200_vm1, %v890_v45  ;;  %1436 = vmatprep.mubr.msk.bf16.mxu0 %vm200_vm1, %v993_v21 }
  0x4f   : > { %1426 = vmatprep.mubr.msk.bf16.mxu1 %vm200_vm1, %v891_v5 }
  0x55   : > { %1437 = vmatmul.mubr.msk.bf16.gmra.mxu0 %vm200_vm1, %v994_v25 }
  0x56   : > { %1427 = vmatmul.mubr.msk.bf16.gmra.mxu1 %vm200_vm1, %v892_v54 }
  0xd5   : > { %v1354_v6 = vpop.f32.mrf.mxu0 }
  0xd6   : > { %v1358_v8 = vpop.f32.mrf.mxu1 }
  0xd7   : > { %v251_v10 = vpop.f32.mrf.mxu0 }
  0xd8   : > { %v267_v13 = vpop.f32.mrf.mxu1 }
  0xd9   : > { %v1355_v26 = vpop.f32.mrf.mxu0 }
  0xda   : > { %v1359_v33 = vpop.f32.mrf.mxu1 }
  0xdb   : > { %v254_v34 = vpop.f32.mrf.mxu0 }
  0xdc   : > { %v1765_v43 = vpop.f32.mrf.mxu1 }
  0xdd   : > { %v1374_v52 = vpop.f32.mrf.mxu0 }
  0xde   : > { %v1364_v53 = vpop.f32.mrf.mxu1 }
  0xdf   : > { %v425_v55 = vpop.f32.mrf.mxu0  ;;  %v340_v32 = vadd.f32 %v1364_v53, %v1354_v6 }
  0xe0   : > { %v331_v44 = vpop.f32.mrf.mxu1 }
  0xe1   : > { %v1375_v56 = vpop.f32.mrf.mxu0  ;;  %v332_v37 = vadd.f32 %v331_v44, %v251_v10  ;;  %v458_v19 = vadd.f32 %v1374_v52, %v340_v32 }
  0xe2   : > { %v1365_v57 = vpop.f32.mrf.mxu1 }
  0xe3   : > { %v428_v58 = vpop.f32.mrf.mxu0  ;;  %v343_v28 = vadd.f32 %v1365_v57, %v1355_v26  ;;  %v456_v46 = vadd.f32 %v425_v55, %v332_v37 }
  0xe4   : > { %v334_v59 = vpop.f32.mrf.mxu1 }
  0xe5   : > { %v1378_v14 = vpop.f32.mrf.mxu0  ;;  %v335_v47 = vadd.f32 %v334_v59, %v254_v34  ;;  %v459_v49 = vadd.f32 %v1375_v56, %v343_v28 }
  0xe6   : > { %v1368_v51 = vpop.f32.mrf.mxu1 }
  0xe7   : > { %v441_v54 = vpop.f32.mrf.mxu0  ;;  %v356_v31 = vadd.f32 %v1368_v51, %v1358_v8  ;;  %v457_v5 = vadd.f32 %v428_v58, %v335_v47 }
  0xe8   : > { %v347_v60 = vpop.f32.mrf.mxu1 }
  0xe9   : > { %v1379_v61 = vpop.f32.mrf.mxu0  ;;  %v348_v45 = vadd.f32 %v347_v60, %v267_v13  ;;  %v462_v26 = vadd.f32 %v1378_v14, %v356_v31 }
  0xea   : > { %v1369_v62 = vpop.f32.mrf.mxu1 }
  0xeb   : > { %v1767_v63 = vpop.f32.mrf.mxu0  ;;  %v359_v10 = vadd.f32 %v1369_v62, %v1359_v33  ;;  %v460_v57 = vadd.f32 %v441_v54, %v348_v45 }
  0xec   : > { %v350_v0 = vpop.f32.mrf.mxu1 }
  0xed   : > { %v1394_v1 = vpop.f32.mrf.mxu0  ;;  %v351_v56 = vadd.f32 %v350_v0, %v1765_v43  ;;  %v463_v58 = vadd.f32 %v1379_v61, %v359_v10 }
  0xee   : > { %v1384_v2 = vpop.f32.mrf.mxu1 }
  0xef   : > { %v633_v3 = vpop.f32.mrf.mxu0  ;;  %v562_v48 = vadd.f32 %v1384_v2, %v458_v19 }
  0xf0   : > { %v529_v4 = vpop.f32.mrf.mxu1 }
  0xf1   : > { %v1395_v7 = vpop.f32.mrf.mxu0  ;;  %v560_v42 = vadd.f32 %v529_v4, %v456_v46  ;;  %v666_v9 = vadd.f32 %v1394_v1, %v562_v48 }
  0xf2   : > { %v1385_v11 = vpop.f32.mrf.mxu1 }
  0xf3   : > { %v636_v12 = vpop.f32.mrf.mxu0  ;;  %v563_v25 = vadd.f32 %v1385_v11, %v459_v49  ;;  %v664_v53 = vadd.f32 %v633_v3, %v560_v42  ;;  %v461_v3 = vadd.f32 %v1767_v63, %v351_v56 }
  0xf4   : > { %v532_v15 = vpop.f32.mrf.mxu1 }
  0xf5   : > { %v1398_v16 = vpop.f32.mrf.mxu0  ;;  %v561_v44 = vadd.f32 %v532_v15, %v457_v5  ;;  %v667_v59 = vadd.f32 %v1395_v7, %v563_v25 }
  0xf6   : > { %v1388_v17 = vpop.f32.mrf.mxu1 }
  0xf7   : > { %v649_v18 = vpop.f32.mrf.mxu0  ;;  %v566_v51 = vadd.f32 %v1388_v17, %v462_v26  ;;  %v665_v4 = vadd.f32 %v636_v12, %v561_v44 }
  0xf8   : > { %v545_v20 = vpop.f32.mrf.mxu1 }
  0xf9   : > { %v1769_v22 = vpop.f32.mrf.mxu0  ;;  %v564_v1 = vadd.f32 %v545_v20, %v460_v57  ;;  %v670_v54 = vadd.f32 %v1398_v16, %v566_v51 }
  0xfa   : > { %v1389_v23 = vpop.f32.mrf.mxu1 }
  0xfb   : > { %v1771_v24 = vpop.f32.mrf.mxu0  ;;  %v567_v11 = vadd.f32 %v1389_v23, %v463_v58  ;;  %v668_v17 = vadd.f32 %v649_v18, %v564_v1 }
  0xfc   : > { %v548_v27 = vpop.f32.mrf.mxu1 }
  0xfd   : > { %v1414_v35 = vpop.f32.mrf.mxu0 }
  0xfe   : > { %v1404_v36 = vpop.f32.mrf.mxu1 }
  0xff   : > { %v840_v38 = vpop.f32.mrf.mxu0  ;;  %v768_v34 = vadd.f32 %v1404_v36, %v666_v9  ;;  %v565_v36 = vadd.f32 %v548_v27, %v461_v3 }
 0x100   : > { %v735_v39 = vpop.f32.mrf.mxu1 }
 0x101   : > { %v1415_v40 = vpop.f32.mrf.mxu0  ;;  %v766_v13 = vadd.f32 %v735_v39, %v664_v53  ;;  %v873_v33 = vadd.f32 %v1414_v35, %v768_v34  ;;  %v671_v35 = vadd.f32 %v1769_v22, %v567_v11  ;;  %v669_v28 = vadd.f32 %v1771_v24, %v565_v36 }
 0x102   : > { %v1405_v41 = vpop.f32.mrf.mxu1 }
 0x103   : > { %v843_v29 = vpop.f32.mrf.mxu0  ;;  %v769_v62 = vadd.f32 %v1405_v41, %v667_v59  ;;  %v871_v32 = vadd.f32 %v840_v38, %v766_v13 }
 0x104   : > { %v738_v30 = vpop.f32.mrf.mxu1 }
 0x105   : > { %v1418_v50 = vpop.f32.mrf.mxu0  ;;  %v767_v43 = vadd.f32 %v738_v30, %v665_v4  ;;  %v874_v12 = vadd.f32 %v1415_v40, %v769_v62 }
 0x106   : > { %v1408_v21 = vpop.f32.mrf.mxu1 }
 0x107   : > { %v856_v6 = vpop.f32.mrf.mxu0  ;;  %v772_v20 = vadd.f32 %v1408_v21, %v670_v54  ;;  %v872_v38 = vadd.f32 %v843_v29, %v767_v43 }
 0x108   : > { %v751_v52 = vpop.f32.mrf.mxu1 }
 0x109   : > { %v1419_v55 = vpop.f32.mrf.mxu0  ;;  %v770_v18 = vadd.f32 %v751_v52, %v668_v17  ;;  %v877_v40 = vadd.f32 %v1418_v50, %v772_v20 }
 0x10a   : > { %v1409_v8 = vpop.f32.mrf.mxu1 }
 0x10b   : > { %v859_v60 = vpop.f32.mrf.mxu0  ;;  %v773_v46 = vadd.f32 %v1409_v8, %v671_v35  ;;  %v875_v30 = vadd.f32 %v856_v6, %v770_v18 }
 0x10c   : > { %v754_v2 = vpop.f32.mrf.mxu1 }
 0x10d   : > { %v1434_v14 = vpop.f32.mrf.mxu0  ;;  %v771_v49 = vadd.f32 %v754_v2, %v669_v28  ;;  %v878_v21 = vadd.f32 %v1419_v55, %v773_v46 }
 0x10e   : > { %v1424_v15 = vpop.f32.mrf.mxu1 }
 0x10f   : > { %v977_v0 = vadd.f32 %v1424_v15, %v873_v33  ;;  %v1046_v7 = vpop.f32.mrf.mxu0  ;;  %v876_v10 = vadd.f32 %v859_v60, %v771_v49 }
 0x110   : > { %v944_v61 = vpop.f32.mrf.mxu1 }
 0x111   : > { %v1079_v63 = vadd.f32 %v1434_v14, %v977_v0  ;;  %v975_v23 = vadd.f32 %v944_v61, %v871_v32  ;;  %v1435_v16 = vpop.f32.mrf.mxu0 }
 0x112   : > { %v1425_v37 = vpop.f32.mrf.mxu1 }
 0x113   : > { %1088 = vst.msk [vmem:[%s1779_s14 + $0x10] sm:$0xff] %vm1085_vm2, %v1079_v63  ;;  %v1077_v27 = vadd.f32 %v1046_v7, %v975_v23  ;;  %v978_v39 = vadd.f32 %v1425_v37, %v874_v12  ;;  %v1049_v19 = vpop.f32.mrf.mxu0 }
 0x114   : > { %v947_v41 = vpop.f32.mrf.mxu1 }
 0x115   : > { %1086 = vst.msk [vmem:[%s1779_s14] sm:$0xff] %vm1085_vm2, %v1077_v27  ;;  %v1080_v47 = vadd.f32 %v1435_v16, %v978_v39  ;;  %v976_v48 = vadd.f32 %v947_v41, %v872_v38  ;;  %v1438_v22 = vpop.f32.mrf.mxu0 }
 0x116   : > { %v1428_v29 = vpop.f32.mrf.mxu1 }
 0x117   : > { %1089 = vst.msk [vmem:[%s1779_s14 + $0x18] sm:$0xff] %vm1085_vm2, %v1080_v47  ;;  %v1078_v31 = vadd.f32 %v1049_v19, %v976_v48  ;;  %v981_v42 = vadd.f32 %v1428_v29, %v877_v40  ;;  %v1062_v45 = vpop.f32.mrf.mxu0 }
 0x118   : > { %v960_v24 = vpop.f32.mrf.mxu1 }
 0x119   : > { %1087 = vst.msk [vmem:[%s1779_s14 + $0x8] sm:$0xff] %vm1085_vm2, %v1078_v31  ;;  %v1083_v50 = vadd.f32 %v1438_v22, %v981_v42  ;;  %v979_v5 = vadd.f32 %v960_v24, %v875_v30  ;;  %v1439_v25 = vpop.f32.mrf.mxu0 }
 0x11a   : > { %v1429_v9 = vpop.f32.mrf.mxu1 }
 0x11b   : > { %1092 = vst.msk [vmem:[%s1779_s14 + $0x30] sm:$0xff] %vm1085_vm2, %v1083_v50  ;;  %v1081_v6 = vadd.f32 %v1062_v45, %v979_v5  ;;  %v982_v52 = vadd.f32 %v1429_v9, %v878_v21  ;;  %v1065_v34 = vpop.f32.mrf.mxu0 }
 0x11c   : > { %v963_v26 = vpop.f32.mrf.mxu1 }
 0x11d   : > { %1090 = vst.msk [vmem:[%s1779_s14 + $0x20] sm:$0xff] %vm1085_vm2, %v1081_v6  ;;  %v1084_v53 = vadd.f32 %v1439_v25, %v982_v52  ;;  %v980_v44 = vadd.f32 %v963_v26, %v876_v10 }
 0x11f   : > { %1093 = vst.msk [vmem:[%s1779_s14 + $0x38] sm:$0xff] %vm1085_vm2, %v1084_v53  ;;  %v1082_v55 = vadd.f32 %v1065_v34, %v980_v44 }
 0x121   : > { %1091 = vst.msk [vmem:[%s1779_s14 + $0x28] sm:$0xff] %vm1085_vm2, %v1082_v55 }
 0x122 PF: > { %s12_s11 = sadd.s32 1, %s1499_s11   ;;  %s1811_s9 = smov %s1495_s10 }
 0x123   : > { %p9_p5 = scmp.ge.s32.totalorder %s12_s11, 4   ;;  %s1812_s10 = smov %s1814_s12 }
 0x125   :  { %11 = sbr.rel (!%p9_p5) target bundleno = 2 (0x2), region = 72 }

</bundles_post_ra>
